<compile_context>
chip_gen: v6e
topology: v6e:2x2x1
jax: 0.10.0
libtpu: 0.0.40
codegen_flags: <defaults>
</compile_context>

<pallas_src>
import functools

import jax
import jax.numpy as jnp
from jax import lax
from jax.experimental import pallas as pl
from jax.experimental.pallas import tpu as pltpu


BN_EPS = 1e-5
H = W = 28
K = 5
PAD = 2
C1, C2 = 32, 64
HIDDEN = 1024
NCLS = 10
NPAD = 128           # fc2 output padded to a full lane width
TK_FC1 = 7168        # 50176 = 7 * 7168 -> 7 reduction steps for fc1


def select_config():
    """Generation-specific fc1 tiling (fc1's ~100 MB weight stream is the hot spot)."""
    try:
        kind = jax.devices()[0].device_kind.lower()
    except Exception:
        kind = ""
    if "v7" in kind or "7x" in kind:
        # Dual-TensorCore, 64 MiB VMEM: keep the N axis split (tn=512) so the
        # 'parallel' grid axis shards the weight stream across both cores.
        # (7168 x 512) bf16 blocks double-buffer at ~14.7 MB -> 32 MiB cap is fine.
        return {"tn_fc1": 512, "vmem_fc1": 32 * 1024 * 1024, "fuse_fc2": False}
    # Single-TC v5e / v6e (128 MiB physical VMEM): full-width contiguous N
    # blocks, fewer/larger K blocks, fc2 fused into fc1's final-k epilogue.
    # (7168 x 1024) bf16 blocks double-buffer at ~29.4 MB -> raise cap to 64 MiB.
    return {"tn_fc1": HIDDEN, "vmem_fc1": 64 * 1024 * 1024, "fuse_fc2": True}


# ---------------------- conv (im2col matmul) + BN + ReLU --------------------- #

def _conv_mm_kernel(p_ref, w_ref, b_ref, o_ref):
    # p_ref: (tm, K*K*Cin) im2col patches; w_ref: (K*K*Cin, Cout) with the
    # BatchNorm scale already folded into the columns; b_ref: (1, Cout) folded
    # BN bias.  One MXU matmul, f32 epilogue, cast only at the final store.
    y = jnp.dot(p_ref[...], w_ref[...], preferred_element_type=jnp.float32)
    o_ref[...] = jnp.maximum(y + b_ref[...], 0.0).astype(o_ref.dtype)


def conv_mm_bn_relu(patches, w2d, bias, *, out_dtype=jnp.bfloat16, tm=784):
    M, Kc = patches.shape
    Cout = w2d.shape[1]
    assert M % tm == 0 and tm % 16 == 0
    return pl.pallas_call(
        _conv_mm_kernel,
        out_shape=jax.ShapeDtypeStruct((M, Cout), out_dtype),
        grid=(M // tm,),
        in_specs=[
            pl.BlockSpec((tm, Kc), lambda i: (i, 0)),
            pl.BlockSpec((Kc, Cout), lambda i: (0, 0)),
            pl.BlockSpec((1, Cout), lambda i: (0, 0)),
        ],
        out_specs=pl.BlockSpec((tm, Cout), lambda i: (i, 0)),
        compiler_params=pltpu.CompilerParams(
            dimension_semantics=("parallel",)),
    )(patches, w2d, bias.reshape(1, Cout))


def im2col(x_nhwc):
    """(B,H,W,C) -> (B*H*W, K*K*C) patches; column order (kh, kw, c).
    Preserves dtype, so a bf16 conv1 output yields bf16 conv2 patches."""
    B, Hh, Ww, C = x_nhwc.shape
    xp = jnp.pad(x_nhwc, ((0, 0), (PAD, PAD), (PAD, PAD), (0, 0)))
    cols = [xp[:, kh:kh + Hh, kw:kw + Ww, :] for kh in range(K) for kw in range(K)]
    return jnp.stack(cols, axis=3).reshape(B * Hh * Ww, K * K * C)


# ---------------------------- fully-connected layers ------------------------- #

def _fc_kernel(x_ref, w_ref, b_ref, o_ref, acc_ref, *, apply_relu):
    # Weight is N-block-major: w_ref block is (1, tk, tn), contiguous in HBM.
    # Accumulate in an f32 VMEM scratch; cast once at the final-k epilogue.
    k = pl.program_id(1)

    @pl.when(k == 0)
    def _():
        acc_ref[...] = jnp.zeros_like(acc_ref)

    acc_ref[...] += jnp.dot(x_ref[...], w_ref[0],
                            preferred_element_type=jnp.float32)

    @pl.when(k == pl.num_programs(1) - 1)
    def _():
        y = acc_ref[...] + b_ref[...]
        if apply_relu:
            y = jnp.maximum(y, 0.0)
        o_ref[...] = y.astype(o_ref.dtype)


def fc(x, w3d, b, *, tk, tn, apply_relu, out_dtype=jnp.float32,
       vmem_limit=32 * 1024 * 1024):
    B, Kf = x.shape
    nblk, Kw, tnw = w3d.shape
    assert Kw == Kf and tnw == tn and Kf % tk == 0
    N = nblk * tn
    kernel = functools.partial(_fc_kernel, apply_relu=apply_relu)
    return pl.pallas_call(
        kernel,
        out_shape=jax.ShapeDtypeStruct((B, N), out_dtype),
        grid=(nblk, Kf // tk),                     # reduction (K) axis last
        in_specs=[
            pl.BlockSpec((B, tk), lambda j, k: (0, k)),
            pl.BlockSpec((1, tk, tn), lambda j, k: (j, k, 0)),
            pl.BlockSpec((1, tn), lambda j, k: (0, j)),
        ],
        out_specs=pl.BlockSpec((B, tn), lambda j, k: (0, j)),
        scratch_shapes=[pltpu.VMEM((B, tn), jnp.float32)],
        compiler_params=pltpu.CompilerParams(
            dimension_semantics=("parallel", "arbitrary"),
            vmem_limit_bytes=vmem_limit),
    )(x, w3d, b.reshape(1, N))


def _fc1_fc2_kernel(x_ref, w1_ref, b1_ref, w2_ref, b2_ref, o_ref, acc_ref):
    # fc1 accumulation over K; fc2 (tiny (B,1024)x(1024,128) dot) fused into
    # the final-k epilogue so h never touches HBM and no second launch occurs.
    k = pl.program_id(0)

    @pl.when(k == 0)
    def _():
        acc_ref[...] = jnp.zeros_like(acc_ref)

    acc_ref[...] += jnp.dot(x_ref[...], w1_ref[0],
                            preferred_element_type=jnp.float32)

    @pl.when(k == pl.num_programs(0) - 1)
    def _():
        h = jnp.maximum(acc_ref[...] + b1_ref[...], 0.0)     # f32 epilogue
        o_ref[...] = (jnp.dot(h.astype(jnp.bfloat16), w2_ref[0],
                              preferred_element_type=jnp.float32)
                      + b2_ref[...])


def fc1_fc2_fused(x, w1_3d, b1, w2_3d, b2, *, tk, vmem_limit):
    B, Kf = x.shape
    _, Kw, Nh = w1_3d.shape
    Np = w2_3d.shape[2]
    assert Kw == Kf and Kf % tk == 0
    return pl.pallas_call(
        _fc1_fc2_kernel,
        out_shape=jax.ShapeDtypeStruct((B, Np), jnp.float32),
        grid=(Kf // tk,),
        in_specs=[
            pl.BlockSpec((B, tk), lambda k: (0, k)),
            pl.BlockSpec((1, tk, Nh), lambda k: (0, k, 0)),
            pl.BlockSpec((1, Nh), lambda k: (0, 0)),
            pl.BlockSpec((1, Nh, Np), lambda k: (0, 0, 0)),
            pl.BlockSpec((1, Np), lambda k: (0, 0)),
        ],
        out_specs=pl.BlockSpec((B, Np), lambda k: (0, 0)),
        scratch_shapes=[pltpu.VMEM((B, Nh), jnp.float32)],
        compiler_params=pltpu.CompilerParams(
            dimension_semantics=("arbitrary",),
            vmem_limit_bytes=vmem_limit),
    )(x, w1_3d, b1.reshape(1, Nh), w2_3d, b2.reshape(1, Np))


# -------------------------------- parameters --------------------------------- #

def init_params(key):
    """PyTorch-layout parameters (conv: OIHW, fc: stored as (in, out))."""
    ks = jax.random.split(key, 16)
    p = {}
    # conv1: Conv2d(1, 32, 5, 1, 2) + BatchNorm2d(32)
    p["w1"] = 0.1 * jax.random.normal(ks[0], (C1, 1, K, K), jnp.float32)
    p["cb1"] = 0.05 * jax.random.normal(ks[1], (C1,), jnp.float32)
    p["g1"] = 1.0 + 0.05 * jax.random.normal(ks[2], (C1,), jnp.float32)
    p["beta1"] = 0.05 * jax.random.normal(ks[3], (C1,), jnp.float32)
    p["rm1"] = 0.02 * jax.random.normal(ks[4], (C1,), jnp.float32)
    p["rv1"] = 1.0 + 0.1 * jnp.abs(jax.random.normal(ks[5], (C1,), jnp.float32))
    # conv2: Conv2d(32, 64, 5, 1, 2) + BatchNorm2d(64)
    p["w2"] = 0.05 * jax.random.normal(ks[6], (C2, C1, K, K), jnp.float32)
    p["cb2"] = 0.05 * jax.random.normal(ks[7], (C2,), jnp.float32)
    p["g2"] = 1.0 + 0.05 * jax.random.normal(ks[8], (C2,), jnp.float32)
    p["beta2"] = 0.05 * jax.random.normal(ks[9], (C2,), jnp.float32)
    p["rm2"] = 0.02 * jax.random.normal(ks[10], (C2,), jnp.float32)
    p["rv2"] = 1.0 + 0.1 * jnp.abs(jax.random.normal(ks[11], (C2,), jnp.float32))
    # fc1: Linear(64*28*28, 1024), fc2: Linear(1024, 10); stored transposed (in, out)
    p["fc1_wT"] = 0.01 * jax.random.normal(ks[12], (C2 * H * W, HIDDEN), jnp.float32)
    p["fc1_b"] = 0.01 * jax.random.normal(ks[13], (HIDDEN,), jnp.float32)
    p["fc2_wT"] = 0.05 * jax.random.normal(ks[14], (HIDDEN, NCLS), jnp.float32)
    p["fc2_b"] = 0.05 * jax.random.normal(ks[15], (NCLS,), jnp.float32)
    return p


def _fold_bn(conv_bias, gamma, beta, rmean, rvar):
    scale = gamma / jnp.sqrt(rvar + BN_EPS)
    bias = (conv_bias - rmean) * scale + beta
    return scale, bias


def _block_major(w2d, tn):
    """(K, N) -> (N//tn, K, tn): every (tk, tn) weight block is a contiguous DMA."""
    Kf, N = w2d.shape
    assert N % tn == 0
    return jnp.transpose(w2d.reshape(Kf, N // tn, tn), (1, 0, 2))


def prepare_params(p, cfg):
    """One-time reshuffle: fold BN scale into conv weights, matmul-shape them
    (conv2 in bf16), NHWC-permute + bf16 + N-block-major fc1, lane-pad fc2."""
    q = {}
    s1, b1 = _fold_bn(p["cb1"], p["g1"], p["beta1"], p["rm1"], p["rv1"])
    s2, b2 = _fold_bn(p["cb2"], p["g2"], p["beta2"], p["rm2"], p["rv2"])
    # OIHW -> HWIO -> (K*K*Cin, Cout), row order (kh, kw, cin) matching im2col;
    # BN scale folded into the columns.
    w1 = jnp.transpose(p["w1"], (2, 3, 1, 0)).reshape(K * K * 1, C1) * s1[None, :]
    w2 = jnp.transpose(p["w2"], (2, 3, 1, 0)).reshape(K * K * C1, C2) * s2[None, :]
    q["w1"], q["b1"] = w1, b1                        # conv1 weights stay f32 (tiny)
    q["w2"], q["b2"] = w2.astype(jnp.bfloat16), b2   # conv2 is bf16 x bf16 on the MXU
    # fc1: rows currently in PyTorch (c, h, w) flatten order; permute once to the
    # (h, w, c) order our NHWC conv output flattens to, bf16, N-block-major.
    fc1 = p["fc1_wT"].reshape(C2, H, W, HIDDEN).transpose(1, 2, 0, 3)
    fc1 = fc1.reshape(H * W * C2, HIDDEN)
    q["fc1_w"] = _block_major(fc1, cfg["tn_fc1"]).astype(jnp.bfloat16)
    q["fc1_b"] = p["fc1_b"]
    # fc2: pad N 10 -> 128 (full lane width), bf16, single-block 3-D layout.
    fc2 = jnp.pad(p["fc2_wT"], ((0, 0), (0, NPAD - NCLS)))
    q["fc2_w"] = fc2.reshape(1, HIDDEN, NPAD).astype(jnp.bfloat16)
    q["fc2_b"] = jnp.pad(p["fc2_b"], (0, NPAD - NCLS))
    return q


# -------------------------------- forward pass -------------------------------- #

def forward(x_nchw, q, cfg):
    B = x_nchw.shape[0]
    x = x_nchw.reshape(B, 1, H, W)               # x.view(B, 1, 28, 28)
    x = x.reshape(B, H, W, 1)                    # NCHW -> NHWC is a pure reshape (C=1)

    p1 = im2col(x)                                                # (B*784, 25)  f32
    y1 = conv_mm_bn_relu(p1, q["w1"], q["b1"])                    # (B*784, 32)  bf16
    p2 = im2col(y1.reshape(B, H, W, C1))                          # (B*784, 800) bf16
    y2 = conv_mm_bn_relu(p2, q["w2"], q["b2"])                    # (B*784, 64)  bf16

    # NHWC flatten is a free reshape; fc1 weights were pre-permuted to match.
    flat = y2.reshape(B, H * W * C2)                              # (B, 50176) bf16

    if cfg["fuse_fc2"]:
        # Single-TC chips: full-width fc1 blocks + fc2 fused in the epilogue.
        out = fc1_fc2_fused(flat, q["fc1_w"], q["fc1_b"], q["fc2_w"], q["fc2_b"],
                            tk=TK_FC1, vmem_limit=cfg["vmem_fc1"])   # (B, 128) f32
    else:
        # Dual-TC (v7x): split N across cores; fc1 emits bf16 straight into fc2.
        h = fc(flat, q["fc1_w"], q["fc1_b"], tk=TK_FC1, tn=cfg["tn_fc1"],
               apply_relu=True, out_dtype=jnp.bfloat16,
               vmem_limit=cfg["vmem_fc1"])                           # (B, 1024) bf16
        out = fc(h, q["fc2_w"], q["fc2_b"], tk=HIDDEN, tn=NPAD,
                 apply_relu=False, out_dtype=jnp.float32)            # (B, 128) f32
    return out[:, :NCLS]


# ----------------------------- pure-JAX reference ----------------------------- #

def ref_forward(x_nchw, p):
    B = x_nchw.shape[0]
    s1, b1 = _fold_bn(p["cb1"], p["g1"], p["beta1"], p["rm1"], p["rv1"])
    s2, b2 = _fold_bn(p["cb2"], p["g2"], p["beta2"], p["rm2"], p["rv2"])
    x = jnp.transpose(x_nchw.reshape(B, 1, H, W), (0, 2, 3, 1))
    w1 = jnp.transpose(p["w1"], (2, 3, 1, 0))
    w2 = jnp.transpose(p["w2"], (2, 3, 1, 0))
    y = lax.conv_general_dilated(x, w1, (1, 1), "SAME",
                                 dimension_numbers=("NHWC", "HWIO", "NHWC"))
    y = jnp.maximum(y * s1 + b1, 0.0)
    y = lax.conv_general_dilated(y, w2, (1, 1), "SAME",
                                 dimension_numbers=("NHWC", "HWIO", "NHWC"))
    y = jnp.maximum(y * s2 + b2, 0.0)
    flat = jnp.transpose(y, (0, 3, 1, 2)).reshape(B, C2 * H * W)
    h = jnp.maximum(flat @ p["fc1_wT"] + p["fc1_b"], 0.0)
    return h @ p["fc2_wT"] + p["fc2_b"]


# ------------------------------------ main ------------------------------------ #

if __name__ == "__main__":
    key = jax.random.PRNGKey(0)
    kx, kp = jax.random.split(key)
    x = jax.random.normal(kx, (2, 1, 28, 28), jnp.float32)

    cfg = select_config()
    params = init_params(kp)
    prepared = prepare_params(params, cfg)

    out = jax.block_until_ready(forward(x, prepared, cfg))
    assert out.shape == (2, NCLS) and out.dtype == jnp.float32

    ref = jax.block_until_ready(ref_forward(x, params))
    max_err = float(jnp.max(jnp.abs(out - ref)))
    denom = float(jnp.max(jnp.abs(ref))) + 1e-6
    # bf16 conv2 path + bf16 fc weights/activations -> ~1-2% relative error vs
    # the f32 reference (documented precision/perf trade for inference).
    assert max_err / denom < 5e-2, (max_err, denom)

    print("KERNEL_OK")
</pallas_src>

<mosaic_0001>
module attributes {stable_mosaic.version = 11 : i64} {
  func.func @_conv_mm_kernel(%arg0: i32, %arg1: memref<784x25xf32, #tpu.memory_space<vmem>>, %arg2: memref<25x32xf32, #tpu.memory_space<vmem>>, %arg3: memref<1x32xf32, #tpu.memory_space<vmem>>, %arg4: memref<784x32xbf16, #tpu.memory_space<vmem>>) attributes {dimension_semantics = [#tpu.dimension_semantics<parallel>], iteration_bounds = array<i64: 2>, scalar_prefetch = 0 : i64, scratch_operands = 0 : i64, tpu.core_type = #tpu.core_type<tc>, window_params = [{transform_indices = @transform_0, window_bounds = array<i64: 784, 25>}, {pipeline_mode = #tpu.pipeline_mode<synchronous>, transform_indices = @transform_1, window_bounds = array<i64: 25, 32>}, {pipeline_mode = #tpu.pipeline_mode<synchronous>, transform_indices = @transform_2, window_bounds = array<i64: 1, 32>}, {transform_indices = @transform_3, window_bounds = array<i64: 784, 32>}]} {
    %c0 = arith.constant 0 : index
    %c0_0 = arith.constant 0 : index
    %0 = vector.load %arg1[%c0, %c0_0] : memref<784x25xf32, #tpu.memory_space<vmem>>, vector<784x25xf32>
    %c0_1 = arith.constant 0 : index
    %c0_2 = arith.constant 0 : index
    %1 = vector.load %arg2[%c0_1, %c0_2] : memref<25x32xf32, #tpu.memory_space<vmem>>, vector<25x32xf32>
    %cst = arith.constant dense<0.000000e+00> : vector<784x32xf32>
    %2 = tpu.matmul %0, %1, %cst {dimension_numbers = #tpu.dot_dimension_numbers<[1], [0], [0], [1], [0, 0, 1, 1], [], []>} : vector<784x25xf32>, vector<25x32xf32>, vector<784x32xf32> -> vector<784x32xf32>
    %c0_3 = arith.constant 0 : index
    %c0_4 = arith.constant 0 : index
    %3 = vector.load %arg3[%c0_3, %c0_4] : memref<1x32xf32, #tpu.memory_space<vmem>>, vector<1x32xf32>
    %4 = vector.broadcast %3 : vector<1x32xf32> to vector<784x32xf32>
    %5 = arith.addf %2, %4 : vector<784x32xf32>
    %cst_5 = arith.constant 0.000000e+00 : f32
    %6 = vector.broadcast %cst_5 : f32 to vector<784x32xf32>
    %7 = arith.maximumf %5, %6 : vector<784x32xf32>
    %8 = arith.truncf %7 : vector<784x32xf32> to vector<784x32xbf16>
    %c0_6 = arith.constant 0 : index
    %c0_7 = arith.constant 0 : index
    %9 = vector.load %arg4[%c0_6, %c0_7] : memref<784x32xbf16, #tpu.memory_space<vmem>>, vector<784x32xbf16>
    tpu.vector_store %arg4[%c0_6, %c0_7], %8 {strides = array<i32>} : memref<784x32xbf16, #tpu.memory_space<vmem>>, vector<784x32xbf16>,
    return
  }
  func.func @transform_0(%arg0: i32) -> (i32, i32) {
    %c0_i32 = arith.constant 0 : i32
    %c0_i32_0 = arith.constant 0 : i32
    return %arg0, %c0_i32 : i32, i32
  }
  func.func @transform_1(%arg0: i32) -> (i32, i32) {
    %c0_i32 = arith.constant 0 : i32
    %c0_i32_0 = arith.constant 0 : i32
    %c0_i32_1 = arith.constant 0 : i32
    return %c0_i32, %c0_i32_0 : i32, i32
  }
  func.func @transform_2(%arg0: i32) -> (i32, i32) {
    %c0_i32 = arith.constant 0 : i32
    %c0_i32_0 = arith.constant 0 : i32
    %c0_i32_1 = arith.constant 0 : i32
    return %c0_i32, %c0_i32_0 : i32, i32
  }
  func.func @transform_3(%arg0: i32) -> (i32, i32) {
    %c0_i32 = arith.constant 0 : i32
    %c0_i32_0 = arith.constant 0 : i32
    return %arg0, %c0_i32 : i32, i32
  }
}

</mosaic_0001>

<bundles_post_ra>
// kernel: tpu_custom_call.1
= control target key start
LH: loop header
LB: loop body
LE: loop exit
PB: predicated region body
PF: predicated region fallthrough
CT: control target
= control target key end

     0   :  { %s2388_s12 = smov 0   ;;  %s2920_s0 = inlined_call_operand.vmem [shape: f32[1568,25], index: 0, kind: input, shape index: {}]   ;;  %s2921_s1 = inlined_call_operand.vmem [shape: f32[25,32], index: 1, kind: input, shape index: {}]   ;;  %s2922_s2 = inlined_call_operand.vmem [shape: f32[1,32], index: 2, kind: input, shape index: {}]   ;;  %s2923_s3 = inlined_call_operand.vmem [shape: bf16[1568,32], index: 3, kind: output, shape index: {}]  }
   0x1 LB: > { %s1782_s13 = sadd.s32 4294967295, %s2366_s12   ;;  %p1786_p0 = scmp.ge.s32.totalorder %s2366_s12, 1  ;;  %s2366_s12 = sphi %s2388_s12, %s13_s12  }
   0x2   : > { %p138_p1 = scmp.lt.s32.totalorder %s2366_s12, 3 }
   0x4   : > { %p139_p2 = pnand %p1786_p0, %p138_p1 }
   0x5   : > { %s162_s18 = smul.u32 (!%p139_p2), 98, %s1782_s13 }
   0x6   : > { %142 = sbr.rel (%p139_p2) target bundleno = 319 (0x13f), region = 32 }
   0x7   : > { %p163_p3 = scmp.lt.s32.totalorder (!%p139_p2), %s162_s18, 195 }
   0xb   : > { %v275_v0 = vld [vmem:[%s2921_s1 + $0x18] sm:$0x1]  ;;  %vm578_vm0 = vcmask 1040384   ;;  %v274_v1 = vld [vmem:[%s2921_s1 + $0x10] sm:$0xff]  ;;  %v273_v2 = vld [vmem:[%s2921_s1 + $0x8] sm:$0xff]  ;;  %s2925_s18 = smov (!%p163_p3, %s162_s18), 195 }
   0xc   : > { %2189 = vmatprep.subr.msk.mxu0 %vm578_vm0, %v275_v0  ;;  %2344 = vmatprep.subr.msk.mxu1 %vm578_vm0, %v275_v0  ;;  %v272_v3 = vld [vmem:[%s2921_s1] sm:$0xff]  ;;  %s1787_s23 = sshll.u32 %s2925_s18, 3  ;;  %vm283_vm1 = vcmask 203776   ;;  %s1788_s29 = sshll.u32 %s2925_s18, 2  ;;  %vm1627_vm2 = vcmask 257024  }
   0xd   : > { %2190 = vmatpush3.msk.msra.mxu0 %vm578_vm0, %v275_v0  ;;  %2348 = vmatpush3.msk.msra.mxu1 %vm578_vm0, %v275_v0  ;;  %s2414_s26 = scalar_lea.vmem %s2920_s0, %s1787_s23  ;;  %s2625_s5 = scalar_lea.vmem %s2923_s3, %s1788_s29 }
   0xe   : > { %2191 = vmatprep.subr.mxu0 %v274_v1  ;;  %2345 = vmatprep.subr.mxu1 %v274_v1  ;;  %v174_v4 = vld [vmem:[%s2414_s26] sm:$0xff]  ;;  %v175_v5 = vld [vmem:[%s2414_s26 + $0x8] sm:$0xff]  ;;  %v224_v6 = vld [vmem:[%s2414_s26 + $0x190] sm:$0xff] }
   0xf   : > { %2192 = vmatpush3.msra.mxu0 %v274_v1  ;;  %2349 = vmatpush3.msra.mxu1 %v274_v1  ;;  %v225_v7 = vld [vmem:[%s2414_s26 + $0x198] sm:$0xff]  ;;  %v176_v8 = vld [vmem:[%s2414_s26 + $0x10] sm:$0xff]  ;;  %v226_v9 = vld [vmem:[%s2414_s26 + $0x1a0] sm:$0xff] }
  0x10   : > { %2193 = vmatprep.subr.mxu0 %v273_v2  ;;  %2346 = vmatprep.subr.mxu1 %v273_v2  ;;  %v177_v10 = vld [vmem:[%s2414_s26 + $0x18] sm:$0xff]  ;;  %v227_v11 = vld [vmem:[%s2414_s26 + $0x1a8] sm:$0xff]  ;;  %v178_v12 = vld [vmem:[%s2414_s26 + $0x20] sm:$0xff] }
  0x11   : > { %2194 = vmatpush3.msra.mxu0 %v273_v2  ;;  %2350 = vmatpush3.msra.mxu1 %v273_v2  ;;  %v228_v13 = vld [vmem:[%s2414_s26 + $0x1b0] sm:$0xff]  ;;  %v179_v14 = vld [vmem:[%s2414_s26 + $0x28] sm:$0xff]  ;;  %v229_v15 = vld [vmem:[%s2414_s26 + $0x1b8] sm:$0xff] }
  0x12   : > { %2195 = vmatprep.subr.mxu0 %v272_v3  ;;  %2347 = vmatprep.subr.mxu1 %v272_v3  ;;  %v180_v16 = vld [vmem:[%s2414_s26 + $0x30] sm:$0xff]  ;;  %v230_v17 = vld [vmem:[%s2414_s26 + $0x1c0] sm:$0xff]  ;;  %v181_v18 = vld [vmem:[%s2414_s26 + $0x38] sm:$0xff] }
  0x13   : > { %2196 = vmatpush3.msra.mxu0 %v272_v3  ;;  %2351 = vmatpush3.msra.mxu1 %v272_v3  ;;  %v231_v19 = vld [vmem:[%s2414_s26 + $0x1c8] sm:$0xff]  ;;  %v182_v20 = vld [vmem:[%s2414_s26 + $0x40] sm:$0xff]  ;;  %v232_v21 = vld [vmem:[%s2414_s26 + $0x1d0] sm:$0xff] }
  0x14   : > { %2197 = vmatprep.mubr.msk.f32.mxu0 %vm283_vm1, %v174_v4  ;;  %2272 = vmatprep.mubr.msk.f32.mxu1 %vm283_vm1, %v224_v6  ;;  %v183_v22 = vld [vmem:[%s2414_s26 + $0x48] sm:$0xff]  ;;  %v233_v23 = vld [vmem:[%s2414_s26 + $0x1d8] sm:$0xff]  ;;  %v184_v24 = vld [vmem:[%s2414_s26 + $0x50] sm:$0xff] }
  0x15   : > { %2198 = vmatmul.mubr.msk.f32.vlgmr.msra.gmra.mxu0 %vm283_vm1, %v175_v5  ;;  %2273 = vmatmul.mubr.msk.f32.vlgmr.msra.gmra.mxu1 %vm283_vm1, %v225_v7  ;;  %v234_v25 = vld [vmem:[%s2414_s26 + $0x1e0] sm:$0xff]  ;;  %v185_v26 = vld [vmem:[%s2414_s26 + $0x58] sm:$0xff]  ;;  %v235_v27 = vld [vmem:[%s2414_s26 + $0x1e8] sm:$0xff] }
  0x16   : > { %2200 = vmatprep.mubr.msk.f32.mxu0 %vm283_vm1, %v176_v8  ;;  %2275 = vmatprep.mubr.msk.f32.mxu1 %vm283_vm1, %v226_v9  ;;  %v186_v28 = vld [vmem:[%s2414_s26 + $0x60] sm:$0xff]  ;;  %v236_v29 = vld [vmem:[%s2414_s26 + $0x1f0] sm:$0xff]  ;;  %v187_v30 = vld [vmem:[%s2414_s26 + $0x68] sm:$0xff] }
  0x17   : > { %v237_v31 = vld [vmem:[%s2414_s26 + $0x1f8] sm:$0xff]  ;;  %v188_v32 = vld [vmem:[%s2414_s26 + $0x70] sm:$0xff]  ;;  %v238_v33 = vld [vmem:[%s2414_s26 + $0x200] sm:$0xff] }
  0x18   : > { %v189_v34 = vld [vmem:[%s2414_s26 + $0x78] sm:$0xff]  ;;  %v239_v35 = vld [vmem:[%s2414_s26 + $0x208] sm:$0xff]  ;;  %v190_v36 = vld [vmem:[%s2414_s26 + $0x80] sm:$0xff] }
  0x19   : > { %2201 = vmatmul.mubr.msk.f32.gmra.mxu0 %vm283_vm1, %v177_v10  ;;  %2276 = vmatmul.mubr.msk.f32.gmra.mxu1 %vm283_vm1, %v227_v11  ;;  %v240_v37 = vld [vmem:[%s2414_s26 + $0x210] sm:$0xff]  ;;  %v191_v38 = vld [vmem:[%s2414_s26 + $0x88] sm:$0xff]  ;;  %v241_v39 = vld [vmem:[%s2414_s26 + $0x218] sm:$0xff] }
  0x1a   : > { %2203 = vmatprep.mubr.msk.f32.mxu0 %vm283_vm1, %v178_v12  ;;  %2278 = vmatprep.mubr.msk.f32.mxu1 %vm283_vm1, %v228_v13  ;;  %v192_v40 = vld [vmem:[%s2414_s26 + $0x90] sm:$0xff]  ;;  %v242_v41 = vld [vmem:[%s2414_s26 + $0x220] sm:$0xff]  ;;  %v193_v42 = vld [vmem:[%s2414_s26 + $0x98] sm:$0xff] }
  0x1b   : > { %v243_v43 = vld [vmem:[%s2414_s26 + $0x228] sm:$0xff]  ;;  %v194_v44 = vld [vmem:[%s2414_s26 + $0xa0] sm:$0xff]  ;;  %v244_v45 = vld [vmem:[%s2414_s26 + $0x230] sm:$0xff] }
  0x1c   : > { %v195_v46 = vld [vmem:[%s2414_s26 + $0xa8] sm:$0xff]  ;;  %v245_v47 = vld [vmem:[%s2414_s26 + $0x238] sm:$0xff]  ;;  %v196_v48 = vld [vmem:[%s2414_s26 + $0xb0] sm:$0xff] }
  0x1d   : > { %2204 = vmatmul.mubr.msk.f32.gmra.mxu0 %vm283_vm1, %v179_v14  ;;  %2279 = vmatmul.mubr.msk.f32.gmra.mxu1 %vm283_vm1, %v229_v15  ;;  %v246_v49 = vld [vmem:[%s2414_s26 + $0x240] sm:$0xff]  ;;  %v197_v50 = vld [vmem:[%s2414_s26 + $0xb8] sm:$0xff]  ;;  %v247_v51 = vld [vmem:[%s2414_s26 + $0x248] sm:$0xff] }
  0x1e   : > { %2206 = vmatprep.mubr.msk.f32.mxu0 %vm283_vm1, %v180_v16  ;;  %2281 = vmatprep.mubr.msk.f32.mxu1 %vm283_vm1, %v230_v17  ;;  %v198_v52 = vld [vmem:[%s2414_s26 + $0xc0] sm:$0xff]  ;;  %v248_v53 = vld [vmem:[%s2414_s26 + $0x250] sm:$0xff]  ;;  %v199_v54 = vld [vmem:[%s2414_s26 + $0xc8] sm:$0xff] }
  0x1f   : > { %v249_v55 = vld [vmem:[%s2414_s26 + $0x258] sm:$0xff]  ;;  %v200_v56 = vld [vmem:[%s2414_s26 + $0xd0] sm:$0xff]  ;;  %v250_v57 = vld [vmem:[%s2414_s26 + $0x260] sm:$0xff] }
  0x20   : > { %v201_v58 = vld [vmem:[%s2414_s26 + $0xd8] sm:$0xff]  ;;  %v251_v59 = vld [vmem:[%s2414_s26 + $0x268] sm:$0xff]  ;;  %v202_v60 = vld [vmem:[%s2414_s26 + $0xe0] sm:$0xff] }
  0x21   : > { %2207 = vmatmul.mubr.msk.f32.gmra.mxu0 %vm283_vm1, %v181_v18  ;;  %2282 = vmatmul.mubr.msk.f32.gmra.mxu1 %vm283_vm1, %v231_v19  ;;  %v252_v61 = vld [vmem:[%s2414_s26 + $0x270] sm:$0xff]  ;;  %v203_v62 = vld [vmem:[%s2414_s26 + $0xe8] sm:$0xff]  ;;  %v253_v63 = vld [vmem:[%s2414_s26 + $0x278] sm:$0xff] }
  0x22   : > { %2209 = vmatprep.mubr.msk.f32.mxu0 %vm283_vm1, %v182_v20  ;;  %2284 = vmatprep.mubr.msk.f32.mxu1 %vm283_vm1, %v232_v21  ;;  %v204_v0 = vld [vmem:[%s2414_s26 + $0xf0] sm:$0xff]  ;;  %v254_v1 = vld [vmem:[%s2414_s26 + $0x280] sm:$0xff]  ;;  %v205_v2 = vld [vmem:[%s2414_s26 + $0xf8] sm:$0xff] }
  0x23   : > { %v255_v3 = vld [vmem:[%s2414_s26 + $0x288] sm:$0xff]  ;;  %v206_v4 = vld [vmem:[%s2414_s26 + $0x100] sm:$0xff]  ;;  %v256_v5 = vld [vmem:[%s2414_s26 + $0x290] sm:$0xff] }
  0x24   : > { %v207_v6 = vld [vmem:[%s2414_s26 + $0x108] sm:$0xff]  ;;  %v257_v7 = vld [vmem:[%s2414_s26 + $0x298] sm:$0xff]  ;;  %v208_v8 = vld [vmem:[%s2414_s26 + $0x110] sm:$0xff] }
  0x25   : > { %2210 = vmatmul.mubr.msk.f32.gmra.mxu0 %vm283_vm1, %v183_v22  ;;  %2285 = vmatmul.mubr.msk.f32.gmra.mxu1 %vm283_vm1, %v233_v23  ;;  %v258_v9 = vld [vmem:[%s2414_s26 + $0x2a0] sm:$0xff]  ;;  %v209_v10 = vld [vmem:[%s2414_s26 + $0x118] sm:$0xff]  ;;  %v259_v11 = vld [vmem:[%s2414_s26 + $0x2a8] sm:$0xff] }
  0x26   : > { %2212 = vmatprep.mubr.msk.f32.mxu0 %vm283_vm1, %v184_v24  ;;  %2287 = vmatprep.mubr.msk.f32.mxu1 %vm283_vm1, %v234_v25  ;;  %v210_v12 = vld [vmem:[%s2414_s26 + $0x120] sm:$0xff]  ;;  %v260_v13 = vld [vmem:[%s2414_s26 + $0x2b0] sm:$0xff]  ;;  %v211_v14 = vld [vmem:[%s2414_s26 + $0x128] sm:$0xff] }
  0x27   : > { %v261_v15 = vld [vmem:[%s2414_s26 + $0x2b8] sm:$0xff]  ;;  %v212_v16 = vld [vmem:[%s2414_s26 + $0x130] sm:$0xff]  ;;  %v262_v17 = vld [vmem:[%s2414_s26 + $0x2c0] sm:$0xff] }
  0x28   : > { %v213_v18 = vld [vmem:[%s2414_s26 + $0x138] sm:$0xff]  ;;  %v263_v19 = vld [vmem:[%s2414_s26 + $0x2c8] sm:$0xff]  ;;  %v214_v20 = vld [vmem:[%s2414_s26 + $0x140] sm:$0xff] }
  0x29   : > { %2213 = vmatmul.mubr.msk.f32.gmra.mxu0 %vm283_vm1, %v185_v26  ;;  %2288 = vmatmul.mubr.msk.f32.gmra.mxu1 %vm283_vm1, %v235_v27  ;;  %v264_v21 = vld [vmem:[%s2414_s26 + $0x2d0] sm:$0xff]  ;;  %v215_v22 = vld [vmem:[%s2414_s26 + $0x148] sm:$0xff]  ;;  %v265_v23 = vld [vmem:[%s2414_s26 + $0x2d8] sm:$0xff] }
  0x2a   : > { %2215 = vmatprep.mubr.msk.f32.mxu0 %vm283_vm1, %v186_v28  ;;  %2290 = vmatprep.mubr.msk.f32.mxu1 %vm283_vm1, %v236_v29  ;;  %v216_v24 = vld [vmem:[%s2414_s26 + $0x150] sm:$0xff]  ;;  %v266_v25 = vld [vmem:[%s2414_s26 + $0x2e0] sm:$0xff]  ;;  %v217_v26 = vld [vmem:[%s2414_s26 + $0x158] sm:$0xff] }
  0x2b   : > { %v267_v27 = vld [vmem:[%s2414_s26 + $0x2e8] sm:$0xff]  ;;  %v218_v28 = vld [vmem:[%s2414_s26 + $0x160] sm:$0xff]  ;;  %v268_v29 = vld [vmem:[%s2414_s26 + $0x2f0] sm:$0xff] }
  0x2d   : > { %2216 = vmatmul.mubr.msk.f32.gmra.mxu0 %vm283_vm1, %v187_v30  ;;  %2291 = vmatmul.mubr.msk.f32.gmra.mxu1 %vm283_vm1, %v237_v31  ;;  %v219_v30 = vld [vmem:[%s2414_s26 + $0x168] sm:$0xff]  ;;  %v269_v31 = vld [vmem:[%s2414_s26 + $0x2f8] sm:$0xff] }
  0x2e   : > { %2218 = vmatprep.mubr.msk.f32.mxu0 %vm283_vm1, %v188_v32  ;;  %2293 = vmatprep.mubr.msk.f32.mxu1 %vm283_vm1, %v238_v33  ;;  %v220_v32 = vld [vmem:[%s2414_s26 + $0x170] sm:$0xff]  ;;  %v270_v33 = vld [vmem:[%s2414_s26 + $0x300] sm:$0xff] }
  0x31   : > { %2219 = vmatmul.mubr.msk.f32.gmra.mxu0 %vm283_vm1, %v189_v34  ;;  %2294 = vmatmul.mubr.msk.f32.gmra.mxu1 %vm283_vm1, %v239_v35  ;;  %v221_v34 = vld [vmem:[%s2414_s26 + $0x178] sm:$0xff]  ;;  %v271_v35 = vld [vmem:[%s2414_s26 + $0x308] sm:$0xff] }
  0x32   : > { %2221 = vmatprep.mubr.msk.f32.mxu0 %vm283_vm1, %v190_v36  ;;  %2296 = vmatprep.mubr.msk.f32.mxu1 %vm283_vm1, %v240_v37  ;;  %v222_v36 = vld [vmem:[%s2414_s26 + $0x180] sm:$0xff]  ;;  %v223_v37 = vld [vmem:[%s2414_s26 + $0x188] sm:$0xff] }
  0x35   : > { %2222 = vmatmul.mubr.msk.f32.gmra.mxu0 %vm283_vm1, %v191_v38  ;;  %2297 = vmatmul.mubr.msk.f32.gmra.mxu1 %vm283_vm1, %v241_v39  ;;  %v2615_v38 = vld [vmem:[%s2922_s2] ss:$0 sm:$0xff] }
  0x36   : > { %2224 = vmatprep.mubr.msk.f32.mxu0 %vm283_vm1, %v192_v40  ;;  %2299 = vmatprep.mubr.msk.f32.mxu1 %vm283_vm1, %v242_v41 }
  0x39   : > { %2225 = vmatmul.mubr.msk.f32.gmra.mxu0 %vm283_vm1, %v193_v42  ;;  %2300 = vmatmul.mubr.msk.f32.gmra.mxu1 %vm283_vm1, %v243_v43 }
  0x3a   : > { %2227 = vmatprep.mubr.msk.f32.mxu0 %vm283_vm1, %v194_v44  ;;  %2302 = vmatprep.mubr.msk.f32.mxu1 %vm283_vm1, %v244_v45 }
  0x3d   : > { %2228 = vmatmul.mubr.msk.f32.gmra.mxu0 %vm283_vm1, %v195_v46  ;;  %2303 = vmatmul.mubr.msk.f32.gmra.mxu1 %vm283_vm1, %v245_v47 }
  0x3e   : > { %2230 = vmatprep.mubr.msk.f32.mxu0 %vm283_vm1, %v196_v48  ;;  %2305 = vmatprep.mubr.msk.f32.mxu1 %vm283_vm1, %v246_v49 }
  0x41   : > { %2231 = vmatmul.mubr.msk.f32.gmra.mxu0 %vm283_vm1, %v197_v50  ;;  %2306 = vmatmul.mubr.msk.f32.gmra.mxu1 %vm283_vm1, %v247_v51 }
  0x42   : > { %2233 = vmatprep.mubr.msk.f32.mxu0 %vm283_vm1, %v198_v52  ;;  %2308 = vmatprep.mubr.msk.f32.mxu1 %vm283_vm1, %v248_v53 }
  0x45   : > { %2234 = vmatmul.mubr.msk.f32.gmra.mxu0 %vm283_vm1, %v199_v54  ;;  %2309 = vmatmul.mubr.msk.f32.gmra.mxu1 %vm283_vm1, %v249_v55 }
  0x46   : > { %2236 = vmatprep.mubr.msk.f32.mxu0 %vm283_vm1, %v200_v56  ;;  %2311 = vmatprep.mubr.msk.f32.mxu1 %vm283_vm1, %v250_v57 }
  0x49   : > { %2237 = vmatmul.mubr.msk.f32.gmra.mxu0 %vm283_vm1, %v201_v58  ;;  %2312 = vmatmul.mubr.msk.f32.gmra.mxu1 %vm283_vm1, %v251_v59 }
  0x4a   : > { %2239 = vmatprep.mubr.msk.f32.mxu0 %vm283_vm1, %v202_v60  ;;  %2314 = vmatprep.mubr.msk.f32.mxu1 %vm283_vm1, %v252_v61 }
  0x4d   : > { %2240 = vmatmul.mubr.msk.f32.gmra.mxu0 %vm283_vm1, %v203_v62  ;;  %2315 = vmatmul.mubr.msk.f32.gmra.mxu1 %vm283_vm1, %v253_v63 }
  0x4e   : > { %2242 = vmatprep.mubr.msk.f32.mxu0 %vm283_vm1, %v204_v0  ;;  %2317 = vmatprep.mubr.msk.f32.mxu1 %vm283_vm1, %v254_v1 }
  0x51   : > { %2243 = vmatmul.mubr.msk.f32.gmra.mxu0 %vm283_vm1, %v205_v2  ;;  %2318 = vmatmul.mubr.msk.f32.gmra.mxu1 %vm283_vm1, %v255_v3 }
  0x52   : > { %2245 = vmatprep.mubr.msk.f32.mxu0 %vm283_vm1, %v206_v4  ;;  %2320 = vmatprep.mubr.msk.f32.mxu1 %vm283_vm1, %v256_v5 }
  0x55   : > { %2246 = vmatmul.mubr.msk.f32.gmra.mxu0 %vm283_vm1, %v207_v6  ;;  %2321 = vmatmul.mubr.msk.f32.gmra.mxu1 %vm283_vm1, %v257_v7 }
  0x56   : > { %2248 = vmatprep.mubr.msk.f32.mxu0 %vm283_vm1, %v208_v8  ;;  %2323 = vmatprep.mubr.msk.f32.mxu1 %vm283_vm1, %v258_v9 }
  0x59   : > { %2249 = vmatmul.mubr.msk.f32.gmra.mxu0 %vm283_vm1, %v209_v10  ;;  %2324 = vmatmul.mubr.msk.f32.gmra.mxu1 %vm283_vm1, %v259_v11 }
  0x5a   : > { %2251 = vmatprep.mubr.msk.f32.mxu0 %vm283_vm1, %v210_v12  ;;  %2326 = vmatprep.mubr.msk.f32.mxu1 %vm283_vm1, %v260_v13 }
  0x5d   : > { %2252 = vmatmul.mubr.msk.f32.gmra.mxu0 %vm283_vm1, %v211_v14  ;;  %2327 = vmatmul.mubr.msk.f32.gmra.mxu1 %vm283_vm1, %v261_v15 }
  0x5e   : > { %2254 = vmatprep.mubr.msk.f32.mxu0 %vm283_vm1, %v212_v16  ;;  %2329 = vmatprep.mubr.msk.f32.mxu1 %vm283_vm1, %v262_v17 }
  0x61   : > { %2255 = vmatmul.mubr.msk.f32.gmra.mxu0 %vm283_vm1, %v213_v18  ;;  %2330 = vmatmul.mubr.msk.f32.gmra.mxu1 %vm283_vm1, %v263_v19 }
  0x62   : > { %2257 = vmatprep.mubr.msk.f32.mxu0 %vm283_vm1, %v214_v20  ;;  %2332 = vmatprep.mubr.msk.f32.mxu1 %vm283_vm1, %v264_v21 }
  0x65   : > { %2258 = vmatmul.mubr.msk.f32.gmra.mxu0 %vm283_vm1, %v215_v22  ;;  %2333 = vmatmul.mubr.msk.f32.gmra.mxu1 %vm283_vm1, %v265_v23 }
  0x66   : > { %2260 = vmatprep.mubr.msk.f32.mxu0 %vm283_vm1, %v216_v24  ;;  %2335 = vmatprep.mubr.msk.f32.mxu1 %vm283_vm1, %v266_v25 }
  0x69   : > { %2261 = vmatmul.mubr.msk.f32.gmra.mxu0 %vm283_vm1, %v217_v26  ;;  %2336 = vmatmul.mubr.msk.f32.gmra.mxu1 %vm283_vm1, %v267_v27 }
  0x6a   : > { %2263 = vmatprep.mubr.msk.f32.mxu0 %vm283_vm1, %v218_v28  ;;  %2338 = vmatprep.mubr.msk.f32.mxu1 %vm283_vm1, %v268_v29 }
  0x6d   : > { %2264 = vmatmul.mubr.msk.f32.gmra.mxu0 %vm283_vm1, %v219_v30  ;;  %2339 = vmatmul.mubr.msk.f32.gmra.mxu1 %vm283_vm1, %v269_v31 }
  0x6e   : > { %2266 = vmatprep.mubr.msk.f32.mxu0 %vm283_vm1, %v220_v32  ;;  %2341 = vmatprep.mubr.msk.f32.mxu1 %vm283_vm1, %v270_v33 }
  0x71   : > { %2267 = vmatmul.mubr.msk.f32.gmra.mxu0 %vm283_vm1, %v221_v34  ;;  %2342 = vmatmul.mubr.msk.f32.gmra.mxu1 %vm283_vm1, %v271_v35 }
  0x72   : > { %2269 = vmatprep.mubr.msk.f32.mxu0 %vm283_vm1, %v222_v36 }
  0x75   : > { %2270 = vmatmul.mubr.msk.f32.gmra.mxu0 %vm283_vm1, %v223_v37 }
  0xd5   : > { %v2199_v39 = vpop.f32.mrf.mxu0  ;;  %v2274_v40 = vpop.f32.mrf.mxu1 }
  0xd6   : > { %v654_v41 = vadd.f32 %v2199_v39, %v2615_v38  ;;  %v904_v42 = vadd.f32 %v2274_v40, %v2615_v38 }
  0xd7   : > { %v648_v43 = vpop.f32.mrf.mxu0  ;;  %v898_v44 = vpop.f32.mrf.mxu1 }
  0xd8   : > { %v1138_v45 = vmax.f32 %v654_v41, 0.0  ;;  %v649_v46 = vadd.f32 %v2615_v38, %v648_v43  ;;  %v1188_v47 = vmax.f32 %v904_v42, 0.0  ;;  %v899_v48 = vadd.f32 %v2615_v38, %v898_v44 }
  0xd9   : > { %v2202_v49 = vpop.f32.mrf.mxu0  ;;  %v2277_v50 = vpop.f32.mrf.mxu1 }
  0xda   : > { %v1990_v51 = vpack.c.bf16 %v1138_v45, %v1138_v45  ;;  %v1137_v52 = vmax.f32 %v649_v46, 0.0  ;;  %v2040_v53 = vpack.c.bf16 %v1188_v47, %v1188_v47  ;;  %v664_v54 = vadd.f32 %v2202_v49, %v2615_v38 }
  0xdb   : > { %v1187_v55 = vmax.f32 %v899_v48, 0.0  ;;  %v658_v56 = vpop.f32.mrf.mxu0  ;;  %v914_v57 = vadd.f32 %v2277_v50, %v2615_v38  ;;  %v908_v58 = vpop.f32.mrf.mxu1 }
  0xdc   : > { %1629 = vst.msk [vmem:[%s2625_s5 + $0x4] sm:$0xf] %vm1627_vm2, %v1990_v51  ;;  %v1989_v59 = vpack.c.bf16 %v1137_v52, %v1137_v52  ;;  %1679 = vst.msk [vmem:[%s2625_s5 + $0xcc] sm:$0xf] %vm1627_vm2, %v2040_v53  ;;  %v1140_v60 = vmax.f32 %v664_v54, 0.0  ;;  %v659_v61 = vadd.f32 %v2615_v38, %v658_v56  ;;  %v909_v62 = vadd.f32 %v2615_v38, %v908_v58 }
  0xdd   : > { %v2039_v63 = vpack.c.bf16 %v1187_v55, %v1187_v55  ;;  %v1190_v0 = vmax.f32 %v914_v57, 0.0  ;;  %v2205_v1 = vpop.f32.mrf.mxu0  ;;  %v2280_v2 = vpop.f32.mrf.mxu1 }
  0xde   : > { %1628 = vst.msk [vmem:[%s2625_s5] sm:$0xf] %vm1627_vm2, %v1989_v59  ;;  %v1992_v3 = vpack.c.bf16 %v1140_v60, %v1140_v60  ;;  %v1139_v4 = vmax.f32 %v659_v61, 0.0  ;;  %v674_v5 = vadd.f32 %v2205_v1, %v2615_v38  ;;  %v1189_v6 = vmax.f32 %v909_v62, 0.0 }
  0xdf   : > { %1678 = vst.msk [vmem:[%s2625_s5 + $0xc8] sm:$0xf] %vm1627_vm2, %v2039_v63  ;;  %v2042_v7 = vpack.c.bf16 %v1190_v0, %v1190_v0  ;;  %v668_v8 = vpop.f32.mrf.mxu0  ;;  %v924_v9 = vadd.f32 %v2280_v2, %v2615_v38  ;;  %v918_v10 = vpop.f32.mrf.mxu1 }
  0xe0   : > { %1631 = vst.msk [vmem:[%s2625_s5 + $0xc] sm:$0xf] %vm1627_vm2, %v1992_v3  ;;  %v1991_v11 = vpack.c.bf16 %v1139_v4, %v1139_v4  ;;  %v1142_v12 = vmax.f32 %v674_v5, 0.0  ;;  %v2041_v13 = vpack.c.bf16 %v1189_v6, %v1189_v6  ;;  %v669_v14 = vadd.f32 %v2615_v38, %v668_v8 }
  0xe1   : > { %1681 = vst.msk [vmem:[%s2625_s5 + $0xd4] sm:$0xf] %vm1627_vm2, %v2042_v7  ;;  %v1192_v15 = vmax.f32 %v924_v9, 0.0  ;;  %v2208_v16 = vpop.f32.mrf.mxu0  ;;  %v919_v17 = vadd.f32 %v2615_v38, %v918_v10  ;;  %v2283_v18 = vpop.f32.mrf.mxu1 }
  0xe2   : > { %1630 = vst.msk [vmem:[%s2625_s5 + $0x8] sm:$0xf] %vm1627_vm2, %v1991_v11  ;;  %v1994_v19 = vpack.c.bf16 %v1142_v12, %v1142_v12  ;;  %1680 = vst.msk [vmem:[%s2625_s5 + $0xd0] sm:$0xf] %vm1627_vm2, %v2041_v13  ;;  %v1141_v20 = vmax.f32 %v669_v14, 0.0  ;;  %v684_v21 = vadd.f32 %v2208_v16, %v2615_v38  ;;  %v934_v22 = vadd.f32 %v2283_v18, %v2615_v38 }
  0xe3   : > { %v2044_v23 = vpack.c.bf16 %v1192_v15, %v1192_v15  ;;  %v1191_v24 = vmax.f32 %v919_v17, 0.0  ;;  %v678_v25 = vpop.f32.mrf.mxu0  ;;  %v928_v26 = vpop.f32.mrf.mxu1 }
  0xe4   : > { %1633 = vst.msk [vmem:[%s2625_s5 + $0x14] sm:$0xf] %vm1627_vm2, %v1994_v19  ;;  %v1993_v27 = vpack.c.bf16 %v1141_v20, %v1141_v20  ;;  %v1144_v28 = vmax.f32 %v684_v21, 0.0  ;;  %v679_v29 = vadd.f32 %v2615_v38, %v678_v25  ;;  %v1194_v30 = vmax.f32 %v934_v22, 0.0 }
  0xe5   : > { %1683 = vst.msk [vmem:[%s2625_s5 + $0xdc] sm:$0xf] %vm1627_vm2, %v2044_v23  ;;  %v2043_v31 = vpack.c.bf16 %v1191_v24, %v1191_v24  ;;  %v2211_v32 = vpop.f32.mrf.mxu0  ;;  %v929_v33 = vadd.f32 %v2615_v38, %v928_v26  ;;  %v2286_v34 = vpop.f32.mrf.mxu1 }
  0xe6   : > { %1632 = vst.msk [vmem:[%s2625_s5 + $0x10] sm:$0xf] %vm1627_vm2, %v1993_v27  ;;  %v1996_v35 = vpack.c.bf16 %v1144_v28, %v1144_v28  ;;  %v1143_v36 = vmax.f32 %v679_v29, 0.0  ;;  %v2046_v37 = vpack.c.bf16 %v1194_v30, %v1194_v30  ;;  %v694_v39 = vadd.f32 %v2211_v32, %v2615_v38 }
  0xe7   : > { %1682 = vst.msk [vmem:[%s2625_s5 + $0xd8] sm:$0xf] %vm1627_vm2, %v2043_v31  ;;  %v1193_v40 = vmax.f32 %v929_v33, 0.0  ;;  %v688_v41 = vpop.f32.mrf.mxu0  ;;  %v944_v42 = vadd.f32 %v2286_v34, %v2615_v38  ;;  %v938_v43 = vpop.f32.mrf.mxu1 }
  0xe8   : > { %1635 = vst.msk [vmem:[%s2625_s5 + $0x1c] sm:$0xf] %vm1627_vm2, %v1996_v35  ;;  %v1995_v44 = vpack.c.bf16 %v1143_v36, %v1143_v36  ;;  %1685 = vst.msk [vmem:[%s2625_s5 + $0xe4] sm:$0xf] %vm1627_vm2, %v2046_v37  ;;  %v1146_v45 = vmax.f32 %v694_v39, 0.0  ;;  %v689_v46 = vadd.f32 %v2615_v38, %v688_v41  ;;  %v939_v47 = vadd.f32 %v2615_v38, %v938_v43 }
  0xe9   : > { %v2045_v48 = vpack.c.bf16 %v1193_v40, %v1193_v40  ;;  %v1196_v49 = vmax.f32 %v944_v42, 0.0  ;;  %v2214_v50 = vpop.f32.mrf.mxu0  ;;  %v2289_v51 = vpop.f32.mrf.mxu1 }
  0xea   : > { %1634 = vst.msk [vmem:[%s2625_s5 + $0x18] sm:$0xf] %vm1627_vm2, %v1995_v44  ;;  %v1998_v52 = vpack.c.bf16 %v1146_v45, %v1146_v45  ;;  %v1145_v53 = vmax.f32 %v689_v46, 0.0  ;;  %v704_v54 = vadd.f32 %v2214_v50, %v2615_v38  ;;  %v1195_v55 = vmax.f32 %v939_v47, 0.0 }
  0xeb   : > { %1684 = vst.msk [vmem:[%s2625_s5 + $0xe0] sm:$0xf] %vm1627_vm2, %v2045_v48  ;;  %v2048_v56 = vpack.c.bf16 %v1196_v49, %v1196_v49  ;;  %v698_v57 = vpop.f32.mrf.mxu0  ;;  %v954_v58 = vadd.f32 %v2289_v51, %v2615_v38  ;;  %v948_v59 = vpop.f32.mrf.mxu1 }
  0xec   : > { %1637 = vst.msk [vmem:[%s2625_s5 + $0x24] sm:$0xf] %vm1627_vm2, %v1998_v52  ;;  %v1997_v60 = vpack.c.bf16 %v1145_v53, %v1145_v53  ;;  %v1148_v61 = vmax.f32 %v704_v54, 0.0  ;;  %v2047_v62 = vpack.c.bf16 %v1195_v55, %v1195_v55  ;;  %v699_v63 = vadd.f32 %v2615_v38, %v698_v57 }
  0xed   : > { %1687 = vst.msk [vmem:[%s2625_s5 + $0xec] sm:$0xf] %vm1627_vm2, %v2048_v56  ;;  %v1198_v0 = vmax.f32 %v954_v58, 0.0  ;;  %v2217_v1 = vpop.f32.mrf.mxu0  ;;  %v949_v2 = vadd.f32 %v2615_v38, %v948_v59  ;;  %v2292_v3 = vpop.f32.mrf.mxu1 }
  0xee   : > { %1636 = vst.msk [vmem:[%s2625_s5 + $0x20] sm:$0xf] %vm1627_vm2, %v1997_v60  ;;  %v2000_v4 = vpack.c.bf16 %v1148_v61, %v1148_v61  ;;  %1686 = vst.msk [vmem:[%s2625_s5 + $0xe8] sm:$0xf] %vm1627_vm2, %v2047_v62  ;;  %v1147_v5 = vmax.f32 %v699_v63, 0.0  ;;  %v714_v6 = vadd.f32 %v2217_v1, %v2615_v38  ;;  %v964_v7 = vadd.f32 %v2292_v3, %v2615_v38 }
  0xef   : > { %v2050_v8 = vpack.c.bf16 %v1198_v0, %v1198_v0  ;;  %v1197_v9 = vmax.f32 %v949_v2, 0.0  ;;  %v708_v10 = vpop.f32.mrf.mxu0  ;;  %v958_v11 = vpop.f32.mrf.mxu1 }
  0xf0   : > { %1639 = vst.msk [vmem:[%s2625_s5 + $0x2c] sm:$0xf] %vm1627_vm2, %v2000_v4  ;;  %v1999_v12 = vpack.c.bf16 %v1147_v5, %v1147_v5  ;;  %v1150_v13 = vmax.f32 %v714_v6, 0.0  ;;  %v709_v14 = vadd.f32 %v2615_v38, %v708_v10  ;;  %v1200_v15 = vmax.f32 %v964_v7, 0.0 }
  0xf1   : > { %1689 = vst.msk [vmem:[%s2625_s5 + $0xf4] sm:$0xf] %vm1627_vm2, %v2050_v8  ;;  %v2049_v16 = vpack.c.bf16 %v1197_v9, %v1197_v9  ;;  %v2220_v17 = vpop.f32.mrf.mxu0  ;;  %v959_v18 = vadd.f32 %v2615_v38, %v958_v11  ;;  %v2295_v19 = vpop.f32.mrf.mxu1 }
  0xf2   : > { %1638 = vst.msk [vmem:[%s2625_s5 + $0x28] sm:$0xf] %vm1627_vm2, %v1999_v12  ;;  %v2002_v20 = vpack.c.bf16 %v1150_v13, %v1150_v13  ;;  %v1149_v21 = vmax.f32 %v709_v14, 0.0  ;;  %v2052_v22 = vpack.c.bf16 %v1200_v15, %v1200_v15  ;;  %v724_v23 = vadd.f32 %v2220_v17, %v2615_v38 }
  0xf3   : > { %1688 = vst.msk [vmem:[%s2625_s5 + $0xf0] sm:$0xf] %vm1627_vm2, %v2049_v16  ;;  %v1199_v24 = vmax.f32 %v959_v18, 0.0  ;;  %v718_v25 = vpop.f32.mrf.mxu0  ;;  %v974_v26 = vadd.f32 %v2295_v19, %v2615_v38  ;;  %v968_v27 = vpop.f32.mrf.mxu1 }
  0xf4   : > { %1641 = vst.msk [vmem:[%s2625_s5 + $0x34] sm:$0xf] %vm1627_vm2, %v2002_v20  ;;  %v2001_v28 = vpack.c.bf16 %v1149_v21, %v1149_v21  ;;  %1691 = vst.msk [vmem:[%s2625_s5 + $0xfc] sm:$0xf] %vm1627_vm2, %v2052_v22  ;;  %v1152_v29 = vmax.f32 %v724_v23, 0.0  ;;  %v719_v30 = vadd.f32 %v2615_v38, %v718_v25  ;;  %v969_v31 = vadd.f32 %v2615_v38, %v968_v27 }
  0xf5   : > { %v2051_v32 = vpack.c.bf16 %v1199_v24, %v1199_v24  ;;  %v1202_v33 = vmax.f32 %v974_v26, 0.0  ;;  %v2223_v34 = vpop.f32.mrf.mxu0  ;;  %v2298_v35 = vpop.f32.mrf.mxu1 }
  0xf6   : > { %1640 = vst.msk [vmem:[%s2625_s5 + $0x30] sm:$0xf] %vm1627_vm2, %v2001_v28  ;;  %v2004_v36 = vpack.c.bf16 %v1152_v29, %v1152_v29  ;;  %v1151_v37 = vmax.f32 %v719_v30, 0.0  ;;  %v734_v39 = vadd.f32 %v2223_v34, %v2615_v38  ;;  %v1201_v40 = vmax.f32 %v969_v31, 0.0 }
  0xf7   : > { %1690 = vst.msk [vmem:[%s2625_s5 + $0xf8] sm:$0xf] %vm1627_vm2, %v2051_v32  ;;  %v2054_v41 = vpack.c.bf16 %v1202_v33, %v1202_v33  ;;  %v728_v42 = vpop.f32.mrf.mxu0  ;;  %v984_v43 = vadd.f32 %v2298_v35, %v2615_v38  ;;  %v978_v44 = vpop.f32.mrf.mxu1 }
  0xf8   : > { %1643 = vst.msk [vmem:[%s2625_s5 + $0x3c] sm:$0xf] %vm1627_vm2, %v2004_v36  ;;  %v2003_v45 = vpack.c.bf16 %v1151_v37, %v1151_v37  ;;  %v1154_v46 = vmax.f32 %v734_v39, 0.0  ;;  %v2053_v47 = vpack.c.bf16 %v1201_v40, %v1201_v40  ;;  %v729_v48 = vadd.f32 %v2615_v38, %v728_v42 }
  0xf9   : > { %1693 = vst.msk [vmem:[%s2625_s5 + $0x104] sm:$0xf] %vm1627_vm2, %v2054_v41  ;;  %v1204_v49 = vmax.f32 %v984_v43, 0.0  ;;  %v2226_v50 = vpop.f32.mrf.mxu0  ;;  %v979_v51 = vadd.f32 %v2615_v38, %v978_v44  ;;  %v2301_v52 = vpop.f32.mrf.mxu1 }
  0xfa   : > { %1642 = vst.msk [vmem:[%s2625_s5 + $0x38] sm:$0xf] %vm1627_vm2, %v2003_v45  ;;  %v2006_v53 = vpack.c.bf16 %v1154_v46, %v1154_v46  ;;  %1692 = vst.msk [vmem:[%s2625_s5 + $0x100] sm:$0xf] %vm1627_vm2, %v2053_v47  ;;  %v1153_v54 = vmax.f32 %v729_v48, 0.0  ;;  %v744_v55 = vadd.f32 %v2226_v50, %v2615_v38  ;;  %v994_v56 = vadd.f32 %v2301_v52, %v2615_v38 }
  0xfb   : > { %v2056_v57 = vpack.c.bf16 %v1204_v49, %v1204_v49  ;;  %v1203_v58 = vmax.f32 %v979_v51, 0.0  ;;  %v738_v59 = vpop.f32.mrf.mxu0  ;;  %v988_v60 = vpop.f32.mrf.mxu1 }
  0xfc   : > { %1645 = vst.msk [vmem:[%s2625_s5 + $0x44] sm:$0xf] %vm1627_vm2, %v2006_v53  ;;  %v2005_v61 = vpack.c.bf16 %v1153_v54, %v1153_v54  ;;  %v1156_v62 = vmax.f32 %v744_v55, 0.0  ;;  %v739_v63 = vadd.f32 %v2615_v38, %v738_v59  ;;  %v1206_v0 = vmax.f32 %v994_v56, 0.0 }
  0xfd   : > { %1695 = vst.msk [vmem:[%s2625_s5 + $0x10c] sm:$0xf] %vm1627_vm2, %v2056_v57  ;;  %v2055_v1 = vpack.c.bf16 %v1203_v58, %v1203_v58  ;;  %v2229_v2 = vpop.f32.mrf.mxu0  ;;  %v989_v3 = vadd.f32 %v2615_v38, %v988_v60  ;;  %v2304_v4 = vpop.f32.mrf.mxu1 }
  0xfe   : > { %1644 = vst.msk [vmem:[%s2625_s5 + $0x40] sm:$0xf] %vm1627_vm2, %v2005_v61  ;;  %v2008_v5 = vpack.c.bf16 %v1156_v62, %v1156_v62  ;;  %v1155_v6 = vmax.f32 %v739_v63, 0.0  ;;  %v2058_v7 = vpack.c.bf16 %v1206_v0, %v1206_v0  ;;  %v754_v8 = vadd.f32 %v2229_v2, %v2615_v38 }
  0xff   : > { %1694 = vst.msk [vmem:[%s2625_s5 + $0x108] sm:$0xf] %vm1627_vm2, %v2055_v1  ;;  %v1205_v9 = vmax.f32 %v989_v3, 0.0  ;;  %v748_v10 = vpop.f32.mrf.mxu0  ;;  %v1004_v11 = vadd.f32 %v2304_v4, %v2615_v38  ;;  %v998_v12 = vpop.f32.mrf.mxu1 }
 0x100   : > { %1647 = vst.msk [vmem:[%s2625_s5 + $0x4c] sm:$0xf] %vm1627_vm2, %v2008_v5  ;;  %v2007_v13 = vpack.c.bf16 %v1155_v6, %v1155_v6  ;;  %1697 = vst.msk [vmem:[%s2625_s5 + $0x114] sm:$0xf] %vm1627_vm2, %v2058_v7  ;;  %v1158_v14 = vmax.f32 %v754_v8, 0.0  ;;  %v749_v15 = vadd.f32 %v2615_v38, %v748_v10  ;;  %v999_v16 = vadd.f32 %v2615_v38, %v998_v12 }
 0x101   : > { %v2057_v17 = vpack.c.bf16 %v1205_v9, %v1205_v9  ;;  %v1208_v18 = vmax.f32 %v1004_v11, 0.0  ;;  %v2232_v19 = vpop.f32.mrf.mxu0  ;;  %v2307_v20 = vpop.f32.mrf.mxu1 }
 0x102   : > { %1646 = vst.msk [vmem:[%s2625_s5 + $0x48] sm:$0xf] %vm1627_vm2, %v2007_v13  ;;  %v2010_v21 = vpack.c.bf16 %v1158_v14, %v1158_v14  ;;  %v1157_v22 = vmax.f32 %v749_v15, 0.0  ;;  %v764_v23 = vadd.f32 %v2232_v19, %v2615_v38  ;;  %v1207_v24 = vmax.f32 %v999_v16, 0.0 }
 0x103   : > { %1696 = vst.msk [vmem:[%s2625_s5 + $0x110] sm:$0xf] %vm1627_vm2, %v2057_v17  ;;  %v2060_v25 = vpack.c.bf16 %v1208_v18, %v1208_v18  ;;  %v758_v26 = vpop.f32.mrf.mxu0  ;;  %v1014_v27 = vadd.f32 %v2307_v20, %v2615_v38  ;;  %v1008_v28 = vpop.f32.mrf.mxu1 }
 0x104   : > { %1649 = vst.msk [vmem:[%s2625_s5 + $0x54] sm:$0xf] %vm1627_vm2, %v2010_v21  ;;  %v2009_v29 = vpack.c.bf16 %v1157_v22, %v1157_v22  ;;  %v1160_v30 = vmax.f32 %v764_v23, 0.0  ;;  %v2059_v31 = vpack.c.bf16 %v1207_v24, %v1207_v24  ;;  %v759_v32 = vadd.f32 %v2615_v38, %v758_v26 }
 0x105   : > { %1699 = vst.msk [vmem:[%s2625_s5 + $0x11c] sm:$0xf] %vm1627_vm2, %v2060_v25  ;;  %v1210_v33 = vmax.f32 %v1014_v27, 0.0  ;;  %v2235_v34 = vpop.f32.mrf.mxu0  ;;  %v1009_v35 = vadd.f32 %v2615_v38, %v1008_v28  ;;  %v2310_v36 = vpop.f32.mrf.mxu1 }
 0x106   : > { %1648 = vst.msk [vmem:[%s2625_s5 + $0x50] sm:$0xf] %vm1627_vm2, %v2009_v29  ;;  %v2012_v37 = vpack.c.bf16 %v1160_v30, %v1160_v30  ;;  %1698 = vst.msk [vmem:[%s2625_s5 + $0x118] sm:$0xf] %vm1627_vm2, %v2059_v31  ;;  %v1159_v39 = vmax.f32 %v759_v32, 0.0  ;;  %v774_v40 = vadd.f32 %v2235_v34, %v2615_v38  ;;  %v1024_v41 = vadd.f32 %v2310_v36, %v2615_v38 }
 0x107   : > { %v2062_v42 = vpack.c.bf16 %v1210_v33, %v1210_v33  ;;  %v1209_v43 = vmax.f32 %v1009_v35, 0.0  ;;  %v768_v44 = vpop.f32.mrf.mxu0  ;;  %v1018_v45 = vpop.f32.mrf.mxu1 }
 0x108   : > { %1651 = vst.msk [vmem:[%s2625_s5 + $0x5c] sm:$0xf] %vm1627_vm2, %v2012_v37  ;;  %v2011_v46 = vpack.c.bf16 %v1159_v39, %v1159_v39  ;;  %v1162_v47 = vmax.f32 %v774_v40, 0.0  ;;  %v769_v48 = vadd.f32 %v2615_v38, %v768_v44  ;;  %v1212_v49 = vmax.f32 %v1024_v41, 0.0 }
 0x109   : > { %1701 = vst.msk [vmem:[%s2625_s5 + $0x124] sm:$0xf] %vm1627_vm2, %v2062_v42  ;;  %v2061_v50 = vpack.c.bf16 %v1209_v43, %v1209_v43  ;;  %v2238_v51 = vpop.f32.mrf.mxu0  ;;  %v1019_v52 = vadd.f32 %v2615_v38, %v1018_v45  ;;  %v2313_v53 = vpop.f32.mrf.mxu1 }
 0x10a   : > { %1650 = vst.msk [vmem:[%s2625_s5 + $0x58] sm:$0xf] %vm1627_vm2, %v2011_v46  ;;  %v2014_v54 = vpack.c.bf16 %v1162_v47, %v1162_v47  ;;  %v1161_v55 = vmax.f32 %v769_v48, 0.0  ;;  %v2064_v56 = vpack.c.bf16 %v1212_v49, %v1212_v49  ;;  %v784_v57 = vadd.f32 %v2238_v51, %v2615_v38 }
 0x10b   : > { %1700 = vst.msk [vmem:[%s2625_s5 + $0x120] sm:$0xf] %vm1627_vm2, %v2061_v50  ;;  %v1211_v58 = vmax.f32 %v1019_v52, 0.0  ;;  %v778_v59 = vpop.f32.mrf.mxu0  ;;  %v1034_v60 = vadd.f32 %v2313_v53, %v2615_v38  ;;  %v1028_v61 = vpop.f32.mrf.mxu1 }
 0x10c   : > { %1653 = vst.msk [vmem:[%s2625_s5 + $0x64] sm:$0xf] %vm1627_vm2, %v2014_v54  ;;  %v2013_v62 = vpack.c.bf16 %v1161_v55, %v1161_v55  ;;  %1703 = vst.msk [vmem:[%s2625_s5 + $0x12c] sm:$0xf] %vm1627_vm2, %v2064_v56  ;;  %v1164_v63 = vmax.f32 %v784_v57, 0.0  ;;  %v779_v0 = vadd.f32 %v2615_v38, %v778_v59  ;;  %v1029_v1 = vadd.f32 %v2615_v38, %v1028_v61 }
 0x10d   : > { %v2063_v2 = vpack.c.bf16 %v1211_v58, %v1211_v58  ;;  %v1214_v3 = vmax.f32 %v1034_v60, 0.0  ;;  %v2241_v4 = vpop.f32.mrf.mxu0  ;;  %v2316_v5 = vpop.f32.mrf.mxu1 }
 0x10e   : > { %1652 = vst.msk [vmem:[%s2625_s5 + $0x60] sm:$0xf] %vm1627_vm2, %v2013_v62  ;;  %v2016_v6 = vpack.c.bf16 %v1164_v63, %v1164_v63  ;;  %v1163_v7 = vmax.f32 %v779_v0, 0.0  ;;  %v794_v8 = vadd.f32 %v2241_v4, %v2615_v38  ;;  %v1213_v9 = vmax.f32 %v1029_v1, 0.0 }
 0x10f   : > { %1702 = vst.msk [vmem:[%s2625_s5 + $0x128] sm:$0xf] %vm1627_vm2, %v2063_v2  ;;  %v2066_v10 = vpack.c.bf16 %v1214_v3, %v1214_v3  ;;  %v788_v11 = vpop.f32.mrf.mxu0  ;;  %v1044_v12 = vadd.f32 %v2316_v5, %v2615_v38  ;;  %v1038_v13 = vpop.f32.mrf.mxu1 }
 0x110   : > { %1655 = vst.msk [vmem:[%s2625_s5 + $0x6c] sm:$0xf] %vm1627_vm2, %v2016_v6  ;;  %v2015_v14 = vpack.c.bf16 %v1163_v7, %v1163_v7  ;;  %v1166_v15 = vmax.f32 %v794_v8, 0.0  ;;  %v2065_v16 = vpack.c.bf16 %v1213_v9, %v1213_v9  ;;  %v789_v17 = vadd.f32 %v2615_v38, %v788_v11 }
 0x111   : > { %1705 = vst.msk [vmem:[%s2625_s5 + $0x134] sm:$0xf] %vm1627_vm2, %v2066_v10  ;;  %v1216_v18 = vmax.f32 %v1044_v12, 0.0  ;;  %v2244_v19 = vpop.f32.mrf.mxu0  ;;  %v1039_v20 = vadd.f32 %v2615_v38, %v1038_v13  ;;  %v2319_v21 = vpop.f32.mrf.mxu1 }
 0x112   : > { %1654 = vst.msk [vmem:[%s2625_s5 + $0x68] sm:$0xf] %vm1627_vm2, %v2015_v14  ;;  %v2018_v22 = vpack.c.bf16 %v1166_v15, %v1166_v15  ;;  %1704 = vst.msk [vmem:[%s2625_s5 + $0x130] sm:$0xf] %vm1627_vm2, %v2065_v16  ;;  %v1165_v23 = vmax.f32 %v789_v17, 0.0  ;;  %v804_v24 = vadd.f32 %v2244_v19, %v2615_v38  ;;  %v1054_v25 = vadd.f32 %v2319_v21, %v2615_v38 }
 0x113   : > { %v2068_v26 = vpack.c.bf16 %v1216_v18, %v1216_v18  ;;  %v1215_v27 = vmax.f32 %v1039_v20, 0.0  ;;  %v798_v28 = vpop.f32.mrf.mxu0  ;;  %v1048_v29 = vpop.f32.mrf.mxu1 }
 0x114   : > { %1657 = vst.msk [vmem:[%s2625_s5 + $0x74] sm:$0xf] %vm1627_vm2, %v2018_v22  ;;  %v2017_v30 = vpack.c.bf16 %v1165_v23, %v1165_v23  ;;  %v1168_v31 = vmax.f32 %v804_v24, 0.0  ;;  %v799_v32 = vadd.f32 %v2615_v38, %v798_v28  ;;  %v1218_v33 = vmax.f32 %v1054_v25, 0.0 }
 0x115   : > { %1707 = vst.msk [vmem:[%s2625_s5 + $0x13c] sm:$0xf] %vm1627_vm2, %v2068_v26  ;;  %v2067_v34 = vpack.c.bf16 %v1215_v27, %v1215_v27  ;;  %v2247_v35 = vpop.f32.mrf.mxu0  ;;  %v1049_v36 = vadd.f32 %v2615_v38, %v1048_v29  ;;  %v2322_v37 = vpop.f32.mrf.mxu1 }
 0x116   : > { %1656 = vst.msk [vmem:[%s2625_s5 + $0x70] sm:$0xf] %vm1627_vm2, %v2017_v30  ;;  %v2020_v39 = vpack.c.bf16 %v1168_v31, %v1168_v31  ;;  %v1167_v40 = vmax.f32 %v799_v32, 0.0  ;;  %v2070_v41 = vpack.c.bf16 %v1218_v33, %v1218_v33  ;;  %v814_v42 = vadd.f32 %v2247_v35, %v2615_v38 }
 0x117   : > { %1706 = vst.msk [vmem:[%s2625_s5 + $0x138] sm:$0xf] %vm1627_vm2, %v2067_v34  ;;  %v1217_v43 = vmax.f32 %v1049_v36, 0.0  ;;  %v808_v44 = vpop.f32.mrf.mxu0  ;;  %v1064_v45 = vadd.f32 %v2322_v37, %v2615_v38  ;;  %v1058_v46 = vpop.f32.mrf.mxu1 }
 0x118   : > { %1659 = vst.msk [vmem:[%s2625_s5 + $0x7c] sm:$0xf] %vm1627_vm2, %v2020_v39  ;;  %v2019_v47 = vpack.c.bf16 %v1167_v40, %v1167_v40  ;;  %1709 = vst.msk [vmem:[%s2625_s5 + $0x144] sm:$0xf] %vm1627_vm2, %v2070_v41  ;;  %v1170_v48 = vmax.f32 %v814_v42, 0.0  ;;  %v809_v49 = vadd.f32 %v2615_v38, %v808_v44  ;;  %v1059_v50 = vadd.f32 %v2615_v38, %v1058_v46 }
 0x119   : > { %v2069_v51 = vpack.c.bf16 %v1217_v43, %v1217_v43  ;;  %v1220_v52 = vmax.f32 %v1064_v45, 0.0  ;;  %v2250_v53 = vpop.f32.mrf.mxu0  ;;  %v2325_v54 = vpop.f32.mrf.mxu1 }
 0x11a   : > { %1658 = vst.msk [vmem:[%s2625_s5 + $0x78] sm:$0xf] %vm1627_vm2, %v2019_v47  ;;  %v2022_v55 = vpack.c.bf16 %v1170_v48, %v1170_v48  ;;  %v1169_v56 = vmax.f32 %v809_v49, 0.0  ;;  %v824_v57 = vadd.f32 %v2250_v53, %v2615_v38  ;;  %v1219_v58 = vmax.f32 %v1059_v50, 0.0 }
 0x11b   : > { %1708 = vst.msk [vmem:[%s2625_s5 + $0x140] sm:$0xf] %vm1627_vm2, %v2069_v51  ;;  %v2072_v59 = vpack.c.bf16 %v1220_v52, %v1220_v52  ;;  %v818_v60 = vpop.f32.mrf.mxu0  ;;  %v1074_v61 = vadd.f32 %v2325_v54, %v2615_v38  ;;  %v1068_v62 = vpop.f32.mrf.mxu1 }
 0x11c   : > { %1661 = vst.msk [vmem:[%s2625_s5 + $0x84] sm:$0xf] %vm1627_vm2, %v2022_v55  ;;  %v2021_v63 = vpack.c.bf16 %v1169_v56, %v1169_v56  ;;  %v1172_v0 = vmax.f32 %v824_v57, 0.0  ;;  %v2071_v1 = vpack.c.bf16 %v1219_v58, %v1219_v58  ;;  %v819_v2 = vadd.f32 %v2615_v38, %v818_v60 }
 0x11d   : > { %1711 = vst.msk [vmem:[%s2625_s5 + $0x14c] sm:$0xf] %vm1627_vm2, %v2072_v59  ;;  %v1222_v3 = vmax.f32 %v1074_v61, 0.0  ;;  %v2253_v4 = vpop.f32.mrf.mxu0  ;;  %v1069_v5 = vadd.f32 %v2615_v38, %v1068_v62  ;;  %v2328_v6 = vpop.f32.mrf.mxu1 }
 0x11e   : > { %1660 = vst.msk [vmem:[%s2625_s5 + $0x80] sm:$0xf] %vm1627_vm2, %v2021_v63  ;;  %v2024_v7 = vpack.c.bf16 %v1172_v0, %v1172_v0  ;;  %1710 = vst.msk [vmem:[%s2625_s5 + $0x148] sm:$0xf] %vm1627_vm2, %v2071_v1  ;;  %v1171_v8 = vmax.f32 %v819_v2, 0.0  ;;  %v834_v9 = vadd.f32 %v2253_v4, %v2615_v38  ;;  %v1084_v10 = vadd.f32 %v2328_v6, %v2615_v38 }
 0x11f   : > { %v2074_v11 = vpack.c.bf16 %v1222_v3, %v1222_v3  ;;  %v1221_v12 = vmax.f32 %v1069_v5, 0.0  ;;  %v828_v13 = vpop.f32.mrf.mxu0  ;;  %v1078_v14 = vpop.f32.mrf.mxu1 }
 0x120   : > { %1663 = vst.msk [vmem:[%s2625_s5 + $0x8c] sm:$0xf] %vm1627_vm2, %v2024_v7  ;;  %v2023_v15 = vpack.c.bf16 %v1171_v8, %v1171_v8  ;;  %v1174_v16 = vmax.f32 %v834_v9, 0.0  ;;  %v829_v17 = vadd.f32 %v2615_v38, %v828_v13  ;;  %v1224_v18 = vmax.f32 %v1084_v10, 0.0 }
 0x121   : > { %1713 = vst.msk [vmem:[%s2625_s5 + $0x154] sm:$0xf] %vm1627_vm2, %v2074_v11  ;;  %v2073_v19 = vpack.c.bf16 %v1221_v12, %v1221_v12  ;;  %v2256_v20 = vpop.f32.mrf.mxu0  ;;  %v1079_v21 = vadd.f32 %v2615_v38, %v1078_v14  ;;  %v2331_v22 = vpop.f32.mrf.mxu1 }
 0x122   : > { %1662 = vst.msk [vmem:[%s2625_s5 + $0x88] sm:$0xf] %vm1627_vm2, %v2023_v15  ;;  %v2026_v23 = vpack.c.bf16 %v1174_v16, %v1174_v16  ;;  %v1173_v24 = vmax.f32 %v829_v17, 0.0  ;;  %v2076_v25 = vpack.c.bf16 %v1224_v18, %v1224_v18  ;;  %v844_v26 = vadd.f32 %v2256_v20, %v2615_v38 }
 0x123   : > { %1712 = vst.msk [vmem:[%s2625_s5 + $0x150] sm:$0xf] %vm1627_vm2, %v2073_v19  ;;  %v1223_v27 = vmax.f32 %v1079_v21, 0.0  ;;  %v838_v28 = vpop.f32.mrf.mxu0  ;;  %v1094_v29 = vadd.f32 %v2331_v22, %v2615_v38  ;;  %v1088_v30 = vpop.f32.mrf.mxu1 }
 0x124   : > { %1665 = vst.msk [vmem:[%s2625_s5 + $0x94] sm:$0xf] %vm1627_vm2, %v2026_v23  ;;  %v2025_v31 = vpack.c.bf16 %v1173_v24, %v1173_v24  ;;  %1715 = vst.msk [vmem:[%s2625_s5 + $0x15c] sm:$0xf] %vm1627_vm2, %v2076_v25  ;;  %v1176_v32 = vmax.f32 %v844_v26, 0.0  ;;  %v839_v33 = vadd.f32 %v2615_v38, %v838_v28  ;;  %v1089_v34 = vadd.f32 %v2615_v38, %v1088_v30 }
 0x125   : > { %v2075_v35 = vpack.c.bf16 %v1223_v27, %v1223_v27  ;;  %v1226_v36 = vmax.f32 %v1094_v29, 0.0  ;;  %v2259_v37 = vpop.f32.mrf.mxu0  ;;  %v2334_v39 = vpop.f32.mrf.mxu1 }
 0x126   : > { %1664 = vst.msk [vmem:[%s2625_s5 + $0x90] sm:$0xf] %vm1627_vm2, %v2025_v31  ;;  %v2028_v40 = vpack.c.bf16 %v1176_v32, %v1176_v32  ;;  %v1175_v41 = vmax.f32 %v839_v33, 0.0  ;;  %v854_v42 = vadd.f32 %v2259_v37, %v2615_v38  ;;  %v1225_v43 = vmax.f32 %v1089_v34, 0.0 }
 0x127   : > { %1714 = vst.msk [vmem:[%s2625_s5 + $0x158] sm:$0xf] %vm1627_vm2, %v2075_v35  ;;  %v2078_v44 = vpack.c.bf16 %v1226_v36, %v1226_v36  ;;  %v848_v45 = vpop.f32.mrf.mxu0  ;;  %v1104_v46 = vadd.f32 %v2334_v39, %v2615_v38  ;;  %v1098_v47 = vpop.f32.mrf.mxu1 }
 0x128   : > { %1667 = vst.msk [vmem:[%s2625_s5 + $0x9c] sm:$0xf] %vm1627_vm2, %v2028_v40  ;;  %v2027_v48 = vpack.c.bf16 %v1175_v41, %v1175_v41  ;;  %v1178_v49 = vmax.f32 %v854_v42, 0.0  ;;  %v2077_v50 = vpack.c.bf16 %v1225_v43, %v1225_v43  ;;  %v849_v51 = vadd.f32 %v2615_v38, %v848_v45 }
 0x129   : > { %1717 = vst.msk [vmem:[%s2625_s5 + $0x164] sm:$0xf] %vm1627_vm2, %v2078_v44  ;;  %v1228_v52 = vmax.f32 %v1104_v46, 0.0  ;;  %v2262_v53 = vpop.f32.mrf.mxu0  ;;  %v1099_v54 = vadd.f32 %v2615_v38, %v1098_v47  ;;  %v2337_v55 = vpop.f32.mrf.mxu1 }
 0x12a   : > { %1666 = vst.msk [vmem:[%s2625_s5 + $0x98] sm:$0xf] %vm1627_vm2, %v2027_v48  ;;  %v2030_v56 = vpack.c.bf16 %v1178_v49, %v1178_v49  ;;  %1716 = vst.msk [vmem:[%s2625_s5 + $0x160] sm:$0xf] %vm1627_vm2, %v2077_v50  ;;  %v1177_v57 = vmax.f32 %v849_v51, 0.0  ;;  %v864_v58 = vadd.f32 %v2262_v53, %v2615_v38  ;;  %v1114_v59 = vadd.f32 %v2337_v55, %v2615_v38 }
 0x12b   : > { %v2080_v60 = vpack.c.bf16 %v1228_v52, %v1228_v52  ;;  %v1227_v61 = vmax.f32 %v1099_v54, 0.0  ;;  %v858_v62 = vpop.f32.mrf.mxu0  ;;  %v1108_v63 = vpop.f32.mrf.mxu1 }
 0x12c   : > { %1669 = vst.msk [vmem:[%s2625_s5 + $0xa4] sm:$0xf] %vm1627_vm2, %v2030_v56  ;;  %v2029_v0 = vpack.c.bf16 %v1177_v57, %v1177_v57  ;;  %v1180_v1 = vmax.f32 %v864_v58, 0.0  ;;  %v859_v2 = vadd.f32 %v2615_v38, %v858_v62  ;;  %v1230_v3 = vmax.f32 %v1114_v59, 0.0 }
 0x12d   : > { %1719 = vst.msk [vmem:[%s2625_s5 + $0x16c] sm:$0xf] %vm1627_vm2, %v2080_v60  ;;  %v2079_v4 = vpack.c.bf16 %v1227_v61, %v1227_v61  ;;  %v2265_v5 = vpop.f32.mrf.mxu0  ;;  %v1109_v6 = vadd.f32 %v2615_v38, %v1108_v63  ;;  %v2340_v7 = vpop.f32.mrf.mxu1 }
 0x12e   : > { %1668 = vst.msk [vmem:[%s2625_s5 + $0xa0] sm:$0xf] %vm1627_vm2, %v2029_v0  ;;  %v2032_v8 = vpack.c.bf16 %v1180_v1, %v1180_v1  ;;  %v1179_v9 = vmax.f32 %v859_v2, 0.0  ;;  %v2082_v10 = vpack.c.bf16 %v1230_v3, %v1230_v3  ;;  %v874_v11 = vadd.f32 %v2265_v5, %v2615_v38 }
 0x12f   : > { %1718 = vst.msk [vmem:[%s2625_s5 + $0x168] sm:$0xf] %vm1627_vm2, %v2079_v4  ;;  %v1229_v12 = vmax.f32 %v1109_v6, 0.0  ;;  %v868_v13 = vpop.f32.mrf.mxu0  ;;  %v1124_v14 = vadd.f32 %v2340_v7, %v2615_v38  ;;  %v1118_v15 = vpop.f32.mrf.mxu1 }
 0x130   : > { %1671 = vst.msk [vmem:[%s2625_s5 + $0xac] sm:$0xf] %vm1627_vm2, %v2032_v8  ;;  %v2031_v16 = vpack.c.bf16 %v1179_v9, %v1179_v9  ;;  %1721 = vst.msk [vmem:[%s2625_s5 + $0x174] sm:$0xf] %vm1627_vm2, %v2082_v10  ;;  %v1182_v17 = vmax.f32 %v874_v11, 0.0  ;;  %v869_v18 = vadd.f32 %v2615_v38, %v868_v13  ;;  %v1119_v19 = vadd.f32 %v2615_v38, %v1118_v15 }
 0x131   : > { %v2081_v20 = vpack.c.bf16 %v1229_v12, %v1229_v12  ;;  %v1232_v21 = vmax.f32 %v1124_v14, 0.0  ;;  %v2268_v22 = vpop.f32.mrf.mxu0  ;;  %v2343_v23 = vpop.f32.mrf.mxu1 }
 0x132   : > { %1670 = vst.msk [vmem:[%s2625_s5 + $0xa8] sm:$0xf] %vm1627_vm2, %v2031_v16  ;;  %v2034_v24 = vpack.c.bf16 %v1182_v17, %v1182_v17  ;;  %v1181_v25 = vmax.f32 %v869_v18, 0.0  ;;  %v884_v26 = vadd.f32 %v2268_v22, %v2615_v38  ;;  %v1231_v27 = vmax.f32 %v1119_v19, 0.0 }
 0x133   : > { %1720 = vst.msk [vmem:[%s2625_s5 + $0x170] sm:$0xf] %vm1627_vm2, %v2081_v20  ;;  %v2084_v28 = vpack.c.bf16 %v1232_v21, %v1232_v21  ;;  %v878_v29 = vpop.f32.mrf.mxu0  ;;  %v1134_v30 = vadd.f32 %v2343_v23, %v2615_v38  ;;  %v1128_v31 = vpop.f32.mrf.mxu1 }
 0x134   : > { %1673 = vst.msk [vmem:[%s2625_s5 + $0xb4] sm:$0xf] %vm1627_vm2, %v2034_v24  ;;  %v2033_v32 = vpack.c.bf16 %v1181_v25, %v1181_v25  ;;  %v1184_v33 = vmax.f32 %v884_v26, 0.0  ;;  %v2083_v34 = vpack.c.bf16 %v1231_v27, %v1231_v27  ;;  %v879_v35 = vadd.f32 %v2615_v38, %v878_v29 }
 0x135   : > { %1723 = vst.msk [vmem:[%s2625_s5 + $0x17c] sm:$0xf] %vm1627_vm2, %v2084_v28  ;;  %v1234_v36 = vmax.f32 %v1134_v30, 0.0  ;;  %v2271_v37 = vpop.f32.mrf.mxu0  ;;  %v1129_v39 = vadd.f32 %v2615_v38, %v1128_v31 }
 0x136   : > { %1672 = vst.msk [vmem:[%s2625_s5 + $0xb0] sm:$0xf] %vm1627_vm2, %v2033_v32  ;;  %v2036_v40 = vpack.c.bf16 %v1184_v33, %v1184_v33  ;;  %1722 = vst.msk [vmem:[%s2625_s5 + $0x178] sm:$0xf] %vm1627_vm2, %v2083_v34  ;;  %v1183_v41 = vmax.f32 %v879_v35, 0.0  ;;  %v894_v42 = vadd.f32 %v2271_v37, %v2615_v38 }
 0x137   : > { %v2086_v43 = vpack.c.bf16 %v1234_v36, %v1234_v36  ;;  %v1233_v44 = vmax.f32 %v1129_v39, 0.0  ;;  %v888_v45 = vpop.f32.mrf.mxu0 }
 0x138   : > { %1675 = vst.msk [vmem:[%s2625_s5 + $0xbc] sm:$0xf] %vm1627_vm2, %v2036_v40  ;;  %v2035_v46 = vpack.c.bf16 %v1183_v41, %v1183_v41  ;;  %v1186_v47 = vmax.f32 %v894_v42, 0.0  ;;  %v889_v48 = vadd.f32 %v2615_v38, %v888_v45 }
 0x139   : > { %1725 = vst.msk [vmem:[%s2625_s5 + $0x184] sm:$0xf] %vm1627_vm2, %v2086_v43  ;;  %v2085_v49 = vpack.c.bf16 %v1233_v44, %v1233_v44 }
 0x13a   : > { %1674 = vst.msk [vmem:[%s2625_s5 + $0xb8] sm:$0xf] %vm1627_vm2, %v2035_v46  ;;  %v2038_v50 = vpack.c.bf16 %v1186_v47, %v1186_v47  ;;  %v1185_v51 = vmax.f32 %v889_v48, 0.0 }
 0x13b   : > { %1724 = vst.msk [vmem:[%s2625_s5 + $0x180] sm:$0xf] %vm1627_vm2, %v2085_v49 }
 0x13c   : > { %1677 = vst.msk [vmem:[%s2625_s5 + $0xc4] sm:$0xf] %vm1627_vm2, %v2038_v50  ;;  %v2037_v52 = vpack.c.bf16 %v1185_v51, %v1185_v51 }
 0x13e   : > { %1676 = vst.msk [vmem:[%s2625_s5 + $0xc0] sm:$0xf] %vm1627_vm2, %v2037_v52 }
 0x13f PF: > { %s13_s12 = sadd.s32 1, %s2366_s12  }
 0x140   : > { %p10_p4 = scmp.ge.s32.totalorder %s13_s12, 4  }
 0x142   :  { %12 = sbr.rel (!%p10_p4) target bundleno = 1 (0x1), region = 62 }

</bundles_post_ra>
